<compile_context>
chip_gen: v5e
topology: v5e:2x2
jax: 0.10.0
libtpu: 0.0.40
codegen_flags: <defaults>
</compile_context>

<pallas_src>
import functools
import numpy as np
import jax
import jax.numpy as jnp
from jax.experimental import pallas as pl
from jax.experimental.pallas import tpu as pltpu


def siamese_kernel(win_ref, wc_ref, bc_ref, wf_ref, bf_ref, out_ref,
                   *, batch, h_out, tar):
    """Fused SiameseCNN forward (conv + relu + max/avg pool + FC).

    win_ref : (2*B*h_out*4,) f32 SMEM  pre-gathered 2x2 embedding windows;
                                       element [(n*h_out + i)*4 + k], k over
                                       (s00, s01, s10, s11); rows n = 0..B-1
                                       are text_A, B..2B-1 are text_B.
    wc_ref  : (4, F)      f32 VMEM  conv weight rows, 2x2 window flat (kh,kw)
    bc_ref  : (1, F)      f32 VMEM  conv bias
    wf_ref  : (tar*8, F)  f32 VMEM  fc weight, row t*8+j = weights of slab j
    bf_ref  : (tar,)      f32 SMEM  fc bias
    out_ref : (B, tar)    f32 VMEM  logits
    """
    # Hoist the 4 conv-weight rows and the bias once (each a single (1,F) vreg).
    w00 = wc_ref[0:1, :]
    w01 = wc_ref[1:2, :]
    w10 = wc_ref[2:3, :]
    w11 = wc_ref[3:4, :]
    bias = bc_ref[...]
    inv_h = 1.0 / h_out

    # Conv (4 VPU scalar*vector FMAs per position, static SMEM scalar loads) +
    # ReLU + max/mean pooling; both siamese branches fused in one statically
    # unrolled pass over 2*B rows (B is toy-sized here).
    mx_rows, mn_rows = [], []
    for n in range(2 * batch):
        mx = None
        sm = None
        for i in range(h_out):
            base = (n * h_out + i) * 4
            s00 = win_ref[base]
            s01 = win_ref[base + 1]
            s10 = win_ref[base + 2]
            s11 = win_ref[base + 3]
            act = jnp.maximum(
                bias + s00 * w00 + s01 * w01 + s10 * w10 + s11 * w11, 0.0)
            mx = act if mx is None else jnp.maximum(mx, act)
            sm = act if sm is None else sm + act
        mx_rows.append(mx)                 # max_pool1d over H_out
        mn_rows.append(sm * inv_h)         # avg_pool1d over H_out

    mx_a = jnp.concatenate(mx_rows[:batch], axis=0)   # (B, F)
    mn_a = jnp.concatenate(mn_rows[:batch], axis=0)
    mx_b = jnp.concatenate(mx_rows[batch:], axis=0)
    mn_b = jnp.concatenate(mn_rows[batch:], axis=0)

    # 128-lane feature slabs; slab order matches the fc column blocks
    # [fea_A, fea_B, |fea_A-fea_B|, fea_A*fea_B] with fea_X = [max, mean].
    slabs = (mx_a, mn_a, mx_b, mn_b,
             jnp.abs(mx_a - mx_b), jnp.abs(mn_a - mn_b),
             mx_a * mx_b, mn_a * mn_b)

    # TODO(synk): dropout(p=0.5) is eval-mode identity here.

    # VPU/XLU FC (tar=2): per target, 8 broadcast mul-adds over the slabs then
    # one cross-lane reduction -- no MXU, no padded weight.
    for t in range(tar):
        acc = slabs[0] * wf_ref[t * 8: t * 8 + 1, :]
        for j in range(1, 8):
            acc = acc + slabs[j] * wf_ref[t * 8 + j: t * 8 + j + 1, :]
        out_ref[:, t:t + 1] = jnp.sum(acc, axis=1, keepdims=True) + bf_ref[t]


def prepare_params(params):
    """One-time weight prep (hoisted out of the jitted forward)."""
    embed_table, conv_w, conv_b, fc_w, fc_b = params
    F = conv_w.shape[0]
    tar = fc_w.shape[0]
    assert fc_w.shape[1] == 8 * F
    wc = jnp.asarray(conv_w, jnp.float32).reshape(F, 4).T          # (4, F)
    bc = jnp.asarray(conv_b, jnp.float32).reshape(1, F)            # (1, F)
    wf = jnp.asarray(fc_w, jnp.float32).reshape(tar, 8, F).reshape(tar * 8, F)
    bf = jnp.asarray(fc_b, jnp.float32)                            # (tar,)
    return jnp.asarray(embed_table, jnp.float32), wc, bc, wf, bf


def siamese_cnn_forward(text_a, text_b, prepared, *, embed_size):
    embed_table, wc, bc, wf, bf = prepared
    B, L = text_a.shape
    E = embed_size
    h_out = (L - 2) // E + 1
    tar = bf.shape[0]

    # Per-call (data-dependent) pre-gather of the 2x2 embedding windows:
    # only 2*B*h_out*4 floats ever reach the kernel (SMEM), never the table.
    idx = jnp.arange(h_out) * E
    texts = jnp.concatenate([text_a, text_b], axis=0)              # (2B, L)
    tok0 = texts[:, idx]                                           # (2B, H)
    tok1 = texts[:, idx + 1]
    col0 = embed_table[:, 0]
    col1 = embed_table[:, 1]
    win = jnp.stack([col0[tok0], col1[tok0], col0[tok1], col1[tok1]], axis=-1)
    win_flat = win.reshape(-1).astype(jnp.float32)                 # (2B*H*4,)

    smem = pl.BlockSpec(memory_space=pltpu.MemorySpace.SMEM)
    vmem = pl.BlockSpec(memory_space=pltpu.MemorySpace.VMEM)

    kernel = functools.partial(siamese_kernel, batch=B, h_out=h_out, tar=tar)
    return pl.pallas_call(
        kernel,
        out_shape=jax.ShapeDtypeStruct((B, tar), jnp.float32),
        in_specs=[smem, vmem, vmem, vmem, smem],
        out_specs=vmem,
    )(win_flat, wc, bc, wf, bf)


def reference_forward(text_a, text_b, params, *, embed_size):
    """Pure-JAX reference mirroring the PyTorch module (eval mode)."""
    embed_table, conv_w, conv_b, fc_w, fc_b = params
    E = embed_size
    F = conv_w.shape[0]
    L = text_a.shape[1]
    h_out = (L - 2) // E + 1
    idx = jnp.arange(h_out) * E
    hi = jax.lax.Precision.HIGHEST

    def branch(text):
        emb = jnp.take(embed_table, text, axis=0)                      # (B, L, E)
        win = jnp.stack([emb[:, idx, 0], emb[:, idx, 1],
                         emb[:, idx + 1, 0], emb[:, idx + 1, 1]], -1)  # (B, H, 4)
        conv = jnp.einsum('bhk,fk->bhf', win, conv_w.reshape(F, 4),
                          precision=hi) + conv_b
        conv = jnp.maximum(conv, 0.0)
        return jnp.concatenate([conv.max(axis=1), conv.mean(axis=1)], axis=1)

    fa, fb = branch(text_a), branch(text_b)
    fea = jnp.concatenate([fa, fb, jnp.abs(fa - fb), fa * fb], axis=1)
    return jnp.dot(fea, fc_w.T, precision=hi) + fc_b


def init_params(key, vocab_size, embed_size, num_filters, tar_size):
    k0, k1, k2, k3, k4 = jax.random.split(key, 5)
    embed_table = jax.random.normal(k0, (vocab_size, embed_size), jnp.float32)
    conv_w = 0.1 * jax.random.normal(k1, (num_filters, 1, 2, 2), jnp.float32)
    conv_b = 0.1 * jax.random.normal(k2, (num_filters,), jnp.float32)
    fc_w = 0.05 * jax.random.normal(k3, (tar_size, num_filters * 2 * 4), jnp.float32)
    fc_b = 0.05 * jax.random.normal(k4, (tar_size,), jnp.float32)
    return embed_table, conv_w, conv_b, fc_w, fc_b


if __name__ == "__main__":
    # Small, deterministic config consistent with the module's __init__.
    vocab_size = 50
    embed_size = 2 * int(np.floor(np.power(vocab_size, 0.25)))   # = 4
    tar_size = 2
    num_filters = 128
    batch = 2
    seq_len = 16

    key = jax.random.PRNGKey(0)
    kp, ka, kb = jax.random.split(key, 3)
    params = init_params(kp, vocab_size, embed_size, num_filters, tar_size)
    prepared = prepare_params(params)   # one-time weight prep, outside the jit

    text_a = jax.random.randint(ka, (batch, seq_len), 0, vocab_size, jnp.int32)
    text_b = jax.random.randint(kb, (batch, seq_len), 0, vocab_size, jnp.int32)

    fwd = jax.jit(functools.partial(siamese_cnn_forward, embed_size=embed_size))
    out = jax.block_until_ready(fwd(text_a, text_b, prepared))
    assert out.shape == (batch, tar_size) and out.dtype == jnp.float32

    ref = reference_forward(text_a, text_b, params, embed_size=embed_size)
    assert bool(jnp.allclose(out, ref, atol=1e-2, rtol=1e-2)), (out, ref)
    print("KERNEL_OK")
</pallas_src>

<mosaic_0001>
module attributes {stable_mosaic.version = 11 : i64} {
  func.func @siamese_kernel(%arg0: memref<64xf32, #tpu.memory_space<smem>>, %arg1: memref<4x128xf32, #tpu.memory_space<vmem>>, %arg2: memref<1x128xf32, #tpu.memory_space<vmem>>, %arg3: memref<16x128xf32, #tpu.memory_space<vmem>>, %arg4: memref<2xf32, #tpu.memory_space<smem>>, %arg5: memref<2x2xf32, #tpu.memory_space<vmem>>) attributes {dimension_semantics = [], scalar_prefetch = 0 : i64, scratch_operands = 0 : i64, tpu.core_type = #tpu.core_type<tc>} {
    %c0 = arith.constant 0 : index
    %c0_0 = arith.constant 0 : index
    %0 = vector.load %arg1[%c0, %c0_0] : memref<4x128xf32, #tpu.memory_space<vmem>>, vector<1x128xf32>
    %c1 = arith.constant 1 : index
    %c0_1 = arith.constant 0 : index
    %1 = vector.load %arg1[%c1, %c0_1] : memref<4x128xf32, #tpu.memory_space<vmem>>, vector<1x128xf32>
    %c2 = arith.constant 2 : index
    %c0_2 = arith.constant 0 : index
    %2 = vector.load %arg1[%c2, %c0_2] : memref<4x128xf32, #tpu.memory_space<vmem>>, vector<1x128xf32>
    %c3 = arith.constant 3 : index
    %c0_3 = arith.constant 0 : index
    %3 = vector.load %arg1[%c3, %c0_3] : memref<4x128xf32, #tpu.memory_space<vmem>>, vector<1x128xf32>
    %c0_4 = arith.constant 0 : index
    %c0_5 = arith.constant 0 : index
    %4 = vector.load %arg2[%c0_4, %c0_5] : memref<1x128xf32, #tpu.memory_space<vmem>>, vector<1x128xf32>
    %c0_6 = arith.constant 0 : index
    %5 = memref.load %arg0[%c0_6] : memref<64xf32, #tpu.memory_space<smem>>
    %c1_7 = arith.constant 1 : index
    %6 = memref.load %arg0[%c1_7] : memref<64xf32, #tpu.memory_space<smem>>
    %c2_8 = arith.constant 2 : index
    %7 = memref.load %arg0[%c2_8] : memref<64xf32, #tpu.memory_space<smem>>
    %c3_9 = arith.constant 3 : index
    %8 = memref.load %arg0[%c3_9] : memref<64xf32, #tpu.memory_space<smem>>
    %9 = vector.broadcast %5 : f32 to vector<1x128xf32>
    %10 = arith.mulf %9, %0 : vector<1x128xf32>
    %11 = arith.addf %4, %10 : vector<1x128xf32>
    %12 = vector.broadcast %6 : f32 to vector<1x128xf32>
    %13 = arith.mulf %12, %1 : vector<1x128xf32>
    %14 = arith.addf %11, %13 : vector<1x128xf32>
    %15 = vector.broadcast %7 : f32 to vector<1x128xf32>
    %16 = arith.mulf %15, %2 : vector<1x128xf32>
    %17 = arith.addf %14, %16 : vector<1x128xf32>
    %18 = vector.broadcast %8 : f32 to vector<1x128xf32>
    %19 = arith.mulf %18, %3 : vector<1x128xf32>
    %20 = arith.addf %17, %19 : vector<1x128xf32>
    %cst = arith.constant 0.000000e+00 : f32
    %21 = vector.broadcast %cst : f32 to vector<1x128xf32>
    %22 = arith.maximumf %20, %21 : vector<1x128xf32>
    %c4 = arith.constant 4 : index
    %23 = memref.load %arg0[%c4] : memref<64xf32, #tpu.memory_space<smem>>
    %c5 = arith.constant 5 : index
    %24 = memref.load %arg0[%c5] : memref<64xf32, #tpu.memory_space<smem>>
    %c6 = arith.constant 6 : index
    %25 = memref.load %arg0[%c6] : memref<64xf32, #tpu.memory_space<smem>>
    %c7 = arith.constant 7 : index
    %26 = memref.load %arg0[%c7] : memref<64xf32, #tpu.memory_space<smem>>
    %27 = vector.broadcast %23 : f32 to vector<1x128xf32>
    %28 = arith.mulf %27, %0 : vector<1x128xf32>
    %29 = arith.addf %4, %28 : vector<1x128xf32>
    %30 = vector.broadcast %24 : f32 to vector<1x128xf32>
    %31 = arith.mulf %30, %1 : vector<1x128xf32>
    %32 = arith.addf %29, %31 : vector<1x128xf32>
    %33 = vector.broadcast %25 : f32 to vector<1x128xf32>
    %34 = arith.mulf %33, %2 : vector<1x128xf32>
    %35 = arith.addf %32, %34 : vector<1x128xf32>
    %36 = vector.broadcast %26 : f32 to vector<1x128xf32>
    %37 = arith.mulf %36, %3 : vector<1x128xf32>
    %38 = arith.addf %35, %37 : vector<1x128xf32>
    %cst_10 = arith.constant 0.000000e+00 : f32
    %39 = vector.broadcast %cst_10 : f32 to vector<1x128xf32>
    %40 = arith.maximumf %38, %39 : vector<1x128xf32>
    %41 = arith.maximumf %22, %40 : vector<1x128xf32>
    %42 = arith.addf %22, %40 : vector<1x128xf32>
    %c8 = arith.constant 8 : index
    %43 = memref.load %arg0[%c8] : memref<64xf32, #tpu.memory_space<smem>>
    %c9 = arith.constant 9 : index
    %44 = memref.load %arg0[%c9] : memref<64xf32, #tpu.memory_space<smem>>
    %c10 = arith.constant 10 : index
    %45 = memref.load %arg0[%c10] : memref<64xf32, #tpu.memory_space<smem>>
    %c11 = arith.constant 11 : index
    %46 = memref.load %arg0[%c11] : memref<64xf32, #tpu.memory_space<smem>>
    %47 = vector.broadcast %43 : f32 to vector<1x128xf32>
    %48 = arith.mulf %47, %0 : vector<1x128xf32>
    %49 = arith.addf %4, %48 : vector<1x128xf32>
    %50 = vector.broadcast %44 : f32 to vector<1x128xf32>
    %51 = arith.mulf %50, %1 : vector<1x128xf32>
    %52 = arith.addf %49, %51 : vector<1x128xf32>
    %53 = vector.broadcast %45 : f32 to vector<1x128xf32>
    %54 = arith.mulf %53, %2 : vector<1x128xf32>
    %55 = arith.addf %52, %54 : vector<1x128xf32>
    %56 = vector.broadcast %46 : f32 to vector<1x128xf32>
    %57 = arith.mulf %56, %3 : vector<1x128xf32>
    %58 = arith.addf %55, %57 : vector<1x128xf32>
    %cst_11 = arith.constant 0.000000e+00 : f32
    %59 = vector.broadcast %cst_11 : f32 to vector<1x128xf32>
    %60 = arith.maximumf %58, %59 : vector<1x128xf32>
    %61 = arith.maximumf %41, %60 : vector<1x128xf32>
    %62 = arith.addf %42, %60 : vector<1x128xf32>
    %c12 = arith.constant 12 : index
    %63 = memref.load %arg0[%c12] : memref<64xf32, #tpu.memory_space<smem>>
    %c13 = arith.constant 13 : index
    %64 = memref.load %arg0[%c13] : memref<64xf32, #tpu.memory_space<smem>>
    %c14 = arith.constant 14 : index
    %65 = memref.load %arg0[%c14] : memref<64xf32, #tpu.memory_space<smem>>
    %c15 = arith.constant 15 : index
    %66 = memref.load %arg0[%c15] : memref<64xf32, #tpu.memory_space<smem>>
    %67 = vector.broadcast %63 : f32 to vector<1x128xf32>
    %68 = arith.mulf %67, %0 : vector<1x128xf32>
    %69 = arith.addf %4, %68 : vector<1x128xf32>
    %70 = vector.broadcast %64 : f32 to vector<1x128xf32>
    %71 = arith.mulf %70, %1 : vector<1x128xf32>
    %72 = arith.addf %69, %71 : vector<1x128xf32>
    %73 = vector.broadcast %65 : f32 to vector<1x128xf32>
    %74 = arith.mulf %73, %2 : vector<1x128xf32>
    %75 = arith.addf %72, %74 : vector<1x128xf32>
    %76 = vector.broadcast %66 : f32 to vector<1x128xf32>
    %77 = arith.mulf %76, %3 : vector<1x128xf32>
    %78 = arith.addf %75, %77 : vector<1x128xf32>
    %cst_12 = arith.constant 0.000000e+00 : f32
    %79 = vector.broadcast %cst_12 : f32 to vector<1x128xf32>
    %80 = arith.maximumf %78, %79 : vector<1x128xf32>
    %81 = arith.maximumf %61, %80 : vector<1x128xf32>
    %82 = arith.addf %62, %80 : vector<1x128xf32>
    %cst_13 = arith.constant 2.500000e-01 : f32
    %83 = vector.broadcast %cst_13 : f32 to vector<1x128xf32>
    %84 = arith.mulf %82, %83 : vector<1x128xf32>
    %c16 = arith.constant 16 : index
    %85 = memref.load %arg0[%c16] : memref<64xf32, #tpu.memory_space<smem>>
    %c17 = arith.constant 17 : index
    %86 = memref.load %arg0[%c17] : memref<64xf32, #tpu.memory_space<smem>>
    %c18 = arith.constant 18 : index
    %87 = memref.load %arg0[%c18] : memref<64xf32, #tpu.memory_space<smem>>
    %c19 = arith.constant 19 : index
    %88 = memref.load %arg0[%c19] : memref<64xf32, #tpu.memory_space<smem>>
    %89 = vector.broadcast %85 : f32 to vector<1x128xf32>
    %90 = arith.mulf %89, %0 : vector<1x128xf32>
    %91 = arith.addf %4, %90 : vector<1x128xf32>
    %92 = vector.broadcast %86 : f32 to vector<1x128xf32>
    %93 = arith.mulf %92, %1 : vector<1x128xf32>
    %94 = arith.addf %91, %93 : vector<1x128xf32>
    %95 = vector.broadcast %87 : f32 to vector<1x128xf32>
    %96 = arith.mulf %95, %2 : vector<1x128xf32>
    %97 = arith.addf %94, %96 : vector<1x128xf32>
    %98 = vector.broadcast %88 : f32 to vector<1x128xf32>
    %99 = arith.mulf %98, %3 : vector<1x128xf32>
    %100 = arith.addf %97, %99 : vector<1x128xf32>
    %cst_14 = arith.constant 0.000000e+00 : f32
    %101 = vector.broadcast %cst_14 : f32 to vector<1x128xf32>
    %102 = arith.maximumf %100, %101 : vector<1x128xf32>
    %c20 = arith.constant 20 : index
    %103 = memref.load %arg0[%c20] : memref<64xf32, #tpu.memory_space<smem>>
    %c21 = arith.constant 21 : index
    %104 = memref.load %arg0[%c21] : memref<64xf32, #tpu.memory_space<smem>>
    %c22 = arith.constant 22 : index
    %105 = memref.load %arg0[%c22] : memref<64xf32, #tpu.memory_space<smem>>
    %c23 = arith.constant 23 : index
    %106 = memref.load %arg0[%c23] : memref<64xf32, #tpu.memory_space<smem>>
    %107 = vector.broadcast %103 : f32 to vector<1x128xf32>
    %108 = arith.mulf %107, %0 : vector<1x128xf32>
    %109 = arith.addf %4, %108 : vector<1x128xf32>
    %110 = vector.broadcast %104 : f32 to vector<1x128xf32>
    %111 = arith.mulf %110, %1 : vector<1x128xf32>
    %112 = arith.addf %109, %111 : vector<1x128xf32>
    %113 = vector.broadcast %105 : f32 to vector<1x128xf32>
    %114 = arith.mulf %113, %2 : vector<1x128xf32>
    %115 = arith.addf %112, %114 : vector<1x128xf32>
    %116 = vector.broadcast %106 : f32 to vector<1x128xf32>
    %117 = arith.mulf %116, %3 : vector<1x128xf32>
    %118 = arith.addf %115, %117 : vector<1x128xf32>
    %cst_15 = arith.constant 0.000000e+00 : f32
    %119 = vector.broadcast %cst_15 : f32 to vector<1x128xf32>
    %120 = arith.maximumf %118, %119 : vector<1x128xf32>
    %121 = arith.maximumf %102, %120 : vector<1x128xf32>
    %122 = arith.addf %102, %120 : vector<1x128xf32>
    %c24 = arith.constant 24 : index
    %123 = memref.load %arg0[%c24] : memref<64xf32, #tpu.memory_space<smem>>
    %c25 = arith.constant 25 : index
    %124 = memref.load %arg0[%c25] : memref<64xf32, #tpu.memory_space<smem>>
    %c26 = arith.constant 26 : index
    %125 = memref.load %arg0[%c26] : memref<64xf32, #tpu.memory_space<smem>>
    %c27 = arith.constant 27 : index
    %126 = memref.load %arg0[%c27] : memref<64xf32, #tpu.memory_space<smem>>
    %127 = vector.broadcast %123 : f32 to vector<1x128xf32>
    %128 = arith.mulf %127, %0 : vector<1x128xf32>
    %129 = arith.addf %4, %128 : vector<1x128xf32>
    %130 = vector.broadcast %124 : f32 to vector<1x128xf32>
    %131 = arith.mulf %130, %1 : vector<1x128xf32>
    %132 = arith.addf %129, %131 : vector<1x128xf32>
    %133 = vector.broadcast %125 : f32 to vector<1x128xf32>
    %134 = arith.mulf %133, %2 : vector<1x128xf32>
    %135 = arith.addf %132, %134 : vector<1x128xf32>
    %136 = vector.broadcast %126 : f32 to vector<1x128xf32>
    %137 = arith.mulf %136, %3 : vector<1x128xf32>
    %138 = arith.addf %135, %137 : vector<1x128xf32>
    %cst_16 = arith.constant 0.000000e+00 : f32
    %139 = vector.broadcast %cst_16 : f32 to vector<1x128xf32>
    %140 = arith.maximumf %138, %139 : vector<1x128xf32>
    %141 = arith.maximumf %121, %140 : vector<1x128xf32>
    %142 = arith.addf %122, %140 : vector<1x128xf32>
    %c28 = arith.constant 28 : index
    %143 = memref.load %arg0[%c28] : memref<64xf32, #tpu.memory_space<smem>>
    %c29 = arith.constant 29 : index
    %144 = memref.load %arg0[%c29] : memref<64xf32, #tpu.memory_space<smem>>
    %c30 = arith.constant 30 : index
    %145 = memref.load %arg0[%c30] : memref<64xf32, #tpu.memory_space<smem>>
    %c31 = arith.constant 31 : index
    %146 = memref.load %arg0[%c31] : memref<64xf32, #tpu.memory_space<smem>>
    %147 = vector.broadcast %143 : f32 to vector<1x128xf32>
    %148 = arith.mulf %147, %0 : vector<1x128xf32>
    %149 = arith.addf %4, %148 : vector<1x128xf32>
    %150 = vector.broadcast %144 : f32 to vector<1x128xf32>
    %151 = arith.mulf %150, %1 : vector<1x128xf32>
    %152 = arith.addf %149, %151 : vector<1x128xf32>
    %153 = vector.broadcast %145 : f32 to vector<1x128xf32>
    %154 = arith.mulf %153, %2 : vector<1x128xf32>
    %155 = arith.addf %152, %154 : vector<1x128xf32>
    %156 = vector.broadcast %146 : f32 to vector<1x128xf32>
    %157 = arith.mulf %156, %3 : vector<1x128xf32>
    %158 = arith.addf %155, %157 : vector<1x128xf32>
    %cst_17 = arith.constant 0.000000e+00 : f32
    %159 = vector.broadcast %cst_17 : f32 to vector<1x128xf32>
    %160 = arith.maximumf %158, %159 : vector<1x128xf32>
    %161 = arith.maximumf %141, %160 : vector<1x128xf32>
    %162 = arith.addf %142, %160 : vector<1x128xf32>
    %cst_18 = arith.constant 2.500000e-01 : f32
    %163 = vector.broadcast %cst_18 : f32 to vector<1x128xf32>
    %164 = arith.mulf %162, %163 : vector<1x128xf32>
    %c32 = arith.constant 32 : index
    %165 = memref.load %arg0[%c32] : memref<64xf32, #tpu.memory_space<smem>>
    %c33 = arith.constant 33 : index
    %166 = memref.load %arg0[%c33] : memref<64xf32, #tpu.memory_space<smem>>
    %c34 = arith.constant 34 : index
    %167 = memref.load %arg0[%c34] : memref<64xf32, #tpu.memory_space<smem>>
    %c35 = arith.constant 35 : index
    %168 = memref.load %arg0[%c35] : memref<64xf32, #tpu.memory_space<smem>>
    %169 = vector.broadcast %165 : f32 to vector<1x128xf32>
    %170 = arith.mulf %169, %0 : vector<1x128xf32>
    %171 = arith.addf %4, %170 : vector<1x128xf32>
    %172 = vector.broadcast %166 : f32 to vector<1x128xf32>
    %173 = arith.mulf %172, %1 : vector<1x128xf32>
    %174 = arith.addf %171, %173 : vector<1x128xf32>
    %175 = vector.broadcast %167 : f32 to vector<1x128xf32>
    %176 = arith.mulf %175, %2 : vector<1x128xf32>
    %177 = arith.addf %174, %176 : vector<1x128xf32>
    %178 = vector.broadcast %168 : f32 to vector<1x128xf32>
    %179 = arith.mulf %178, %3 : vector<1x128xf32>
    %180 = arith.addf %177, %179 : vector<1x128xf32>
    %cst_19 = arith.constant 0.000000e+00 : f32
    %181 = vector.broadcast %cst_19 : f32 to vector<1x128xf32>
    %182 = arith.maximumf %180, %181 : vector<1x128xf32>
    %c36 = arith.constant 36 : index
    %183 = memref.load %arg0[%c36] : memref<64xf32, #tpu.memory_space<smem>>
    %c37 = arith.constant 37 : index
    %184 = memref.load %arg0[%c37] : memref<64xf32, #tpu.memory_space<smem>>
    %c38 = arith.constant 38 : index
    %185 = memref.load %arg0[%c38] : memref<64xf32, #tpu.memory_space<smem>>
    %c39 = arith.constant 39 : index
    %186 = memref.load %arg0[%c39] : memref<64xf32, #tpu.memory_space<smem>>
    %187 = vector.broadcast %183 : f32 to vector<1x128xf32>
    %188 = arith.mulf %187, %0 : vector<1x128xf32>
    %189 = arith.addf %4, %188 : vector<1x128xf32>
    %190 = vector.broadcast %184 : f32 to vector<1x128xf32>
    %191 = arith.mulf %190, %1 : vector<1x128xf32>
    %192 = arith.addf %189, %191 : vector<1x128xf32>
    %193 = vector.broadcast %185 : f32 to vector<1x128xf32>
    %194 = arith.mulf %193, %2 : vector<1x128xf32>
    %195 = arith.addf %192, %194 : vector<1x128xf32>
    %196 = vector.broadcast %186 : f32 to vector<1x128xf32>
    %197 = arith.mulf %196, %3 : vector<1x128xf32>
    %198 = arith.addf %195, %197 : vector<1x128xf32>
    %cst_20 = arith.constant 0.000000e+00 : f32
    %199 = vector.broadcast %cst_20 : f32 to vector<1x128xf32>
    %200 = arith.maximumf %198, %199 : vector<1x128xf32>
    %201 = arith.maximumf %182, %200 : vector<1x128xf32>
    %202 = arith.addf %182, %200 : vector<1x128xf32>
    %c40 = arith.constant 40 : index
    %203 = memref.load %arg0[%c40] : memref<64xf32, #tpu.memory_space<smem>>
    %c41 = arith.constant 41 : index
    %204 = memref.load %arg0[%c41] : memref<64xf32, #tpu.memory_space<smem>>
    %c42 = arith.constant 42 : index
    %205 = memref.load %arg0[%c42] : memref<64xf32, #tpu.memory_space<smem>>
    %c43 = arith.constant 43 : index
    %206 = memref.load %arg0[%c43] : memref<64xf32, #tpu.memory_space<smem>>
    %207 = vector.broadcast %203 : f32 to vector<1x128xf32>
    %208 = arith.mulf %207, %0 : vector<1x128xf32>
    %209 = arith.addf %4, %208 : vector<1x128xf32>
    %210 = vector.broadcast %204 : f32 to vector<1x128xf32>
    %211 = arith.mulf %210, %1 : vector<1x128xf32>
    %212 = arith.addf %209, %211 : vector<1x128xf32>
    %213 = vector.broadcast %205 : f32 to vector<1x128xf32>
    %214 = arith.mulf %213, %2 : vector<1x128xf32>
    %215 = arith.addf %212, %214 : vector<1x128xf32>
    %216 = vector.broadcast %206 : f32 to vector<1x128xf32>
    %217 = arith.mulf %216, %3 : vector<1x128xf32>
    %218 = arith.addf %215, %217 : vector<1x128xf32>
    %cst_21 = arith.constant 0.000000e+00 : f32
    %219 = vector.broadcast %cst_21 : f32 to vector<1x128xf32>
    %220 = arith.maximumf %218, %219 : vector<1x128xf32>
    %221 = arith.maximumf %201, %220 : vector<1x128xf32>
    %222 = arith.addf %202, %220 : vector<1x128xf32>
    %c44 = arith.constant 44 : index
    %223 = memref.load %arg0[%c44] : memref<64xf32, #tpu.memory_space<smem>>
    %c45 = arith.constant 45 : index
    %224 = memref.load %arg0[%c45] : memref<64xf32, #tpu.memory_space<smem>>
    %c46 = arith.constant 46 : index
    %225 = memref.load %arg0[%c46] : memref<64xf32, #tpu.memory_space<smem>>
    %c47 = arith.constant 47 : index
    %226 = memref.load %arg0[%c47] : memref<64xf32, #tpu.memory_space<smem>>
    %227 = vector.broadcast %223 : f32 to vector<1x128xf32>
    %228 = arith.mulf %227, %0 : vector<1x128xf32>
    %229 = arith.addf %4, %228 : vector<1x128xf32>
    %230 = vector.broadcast %224 : f32 to vector<1x128xf32>
    %231 = arith.mulf %230, %1 : vector<1x128xf32>
    %232 = arith.addf %229, %231 : vector<1x128xf32>
    %233 = vector.broadcast %225 : f32 to vector<1x128xf32>
    %234 = arith.mulf %233, %2 : vector<1x128xf32>
    %235 = arith.addf %232, %234 : vector<1x128xf32>
    %236 = vector.broadcast %226 : f32 to vector<1x128xf32>
    %237 = arith.mulf %236, %3 : vector<1x128xf32>
    %238 = arith.addf %235, %237 : vector<1x128xf32>
    %cst_22 = arith.constant 0.000000e+00 : f32
    %239 = vector.broadcast %cst_22 : f32 to vector<1x128xf32>
    %240 = arith.maximumf %238, %239 : vector<1x128xf32>
    %241 = arith.maximumf %221, %240 : vector<1x128xf32>
    %242 = arith.addf %222, %240 : vector<1x128xf32>
    %cst_23 = arith.constant 2.500000e-01 : f32
    %243 = vector.broadcast %cst_23 : f32 to vector<1x128xf32>
    %244 = arith.mulf %242, %243 : vector<1x128xf32>
    %c48 = arith.constant 48 : index
    %245 = memref.load %arg0[%c48] : memref<64xf32, #tpu.memory_space<smem>>
    %c49 = arith.constant 49 : index
    %246 = memref.load %arg0[%c49] : memref<64xf32, #tpu.memory_space<smem>>
    %c50 = arith.constant 50 : index
    %247 = memref.load %arg0[%c50] : memref<64xf32, #tpu.memory_space<smem>>
    %c51 = arith.constant 51 : index
    %248 = memref.load %arg0[%c51] : memref<64xf32, #tpu.memory_space<smem>>
    %249 = vector.broadcast %245 : f32 to vector<1x128xf32>
    %250 = arith.mulf %249, %0 : vector<1x128xf32>
    %251 = arith.addf %4, %250 : vector<1x128xf32>
    %252 = vector.broadcast %246 : f32 to vector<1x128xf32>
    %253 = arith.mulf %252, %1 : vector<1x128xf32>
    %254 = arith.addf %251, %253 : vector<1x128xf32>
    %255 = vector.broadcast %247 : f32 to vector<1x128xf32>
    %256 = arith.mulf %255, %2 : vector<1x128xf32>
    %257 = arith.addf %254, %256 : vector<1x128xf32>
    %258 = vector.broadcast %248 : f32 to vector<1x128xf32>
    %259 = arith.mulf %258, %3 : vector<1x128xf32>
    %260 = arith.addf %257, %259 : vector<1x128xf32>
    %cst_24 = arith.constant 0.000000e+00 : f32
    %261 = vector.broadcast %cst_24 : f32 to vector<1x128xf32>
    %262 = arith.maximumf %260, %261 : vector<1x128xf32>
    %c52 = arith.constant 52 : index
    %263 = memref.load %arg0[%c52] : memref<64xf32, #tpu.memory_space<smem>>
    %c53 = arith.constant 53 : index
    %264 = memref.load %arg0[%c53] : memref<64xf32, #tpu.memory_space<smem>>
    %c54 = arith.constant 54 : index
    %265 = memref.load %arg0[%c54] : memref<64xf32, #tpu.memory_space<smem>>
    %c55 = arith.constant 55 : index
    %266 = memref.load %arg0[%c55] : memref<64xf32, #tpu.memory_space<smem>>
    %267 = vector.broadcast %263 : f32 to vector<1x128xf32>
    %268 = arith.mulf %267, %0 : vector<1x128xf32>
    %269 = arith.addf %4, %268 : vector<1x128xf32>
    %270 = vector.broadcast %264 : f32 to vector<1x128xf32>
    %271 = arith.mulf %270, %1 : vector<1x128xf32>
    %272 = arith.addf %269, %271 : vector<1x128xf32>
    %273 = vector.broadcast %265 : f32 to vector<1x128xf32>
    %274 = arith.mulf %273, %2 : vector<1x128xf32>
    %275 = arith.addf %272, %274 : vector<1x128xf32>
    %276 = vector.broadcast %266 : f32 to vector<1x128xf32>
    %277 = arith.mulf %276, %3 : vector<1x128xf32>
    %278 = arith.addf %275, %277 : vector<1x128xf32>
    %cst_25 = arith.constant 0.000000e+00 : f32
    %279 = vector.broadcast %cst_25 : f32 to vector<1x128xf32>
    %280 = arith.maximumf %278, %279 : vector<1x128xf32>
    %281 = arith.maximumf %262, %280 : vector<1x128xf32>
    %282 = arith.addf %262, %280 : vector<1x128xf32>
    %c56 = arith.constant 56 : index
    %283 = memref.load %arg0[%c56] : memref<64xf32, #tpu.memory_space<smem>>
    %c57 = arith.constant 57 : index
    %284 = memref.load %arg0[%c57] : memref<64xf32, #tpu.memory_space<smem>>
    %c58 = arith.constant 58 : index
    %285 = memref.load %arg0[%c58] : memref<64xf32, #tpu.memory_space<smem>>
    %c59 = arith.constant 59 : index
    %286 = memref.load %arg0[%c59] : memref<64xf32, #tpu.memory_space<smem>>
    %287 = vector.broadcast %283 : f32 to vector<1x128xf32>
    %288 = arith.mulf %287, %0 : vector<1x128xf32>
    %289 = arith.addf %4, %288 : vector<1x128xf32>
    %290 = vector.broadcast %284 : f32 to vector<1x128xf32>
    %291 = arith.mulf %290, %1 : vector<1x128xf32>
    %292 = arith.addf %289, %291 : vector<1x128xf32>
    %293 = vector.broadcast %285 : f32 to vector<1x128xf32>
    %294 = arith.mulf %293, %2 : vector<1x128xf32>
    %295 = arith.addf %292, %294 : vector<1x128xf32>
    %296 = vector.broadcast %286 : f32 to vector<1x128xf32>
    %297 = arith.mulf %296, %3 : vector<1x128xf32>
    %298 = arith.addf %295, %297 : vector<1x128xf32>
    %cst_26 = arith.constant 0.000000e+00 : f32
    %299 = vector.broadcast %cst_26 : f32 to vector<1x128xf32>
    %300 = arith.maximumf %298, %299 : vector<1x128xf32>
    %301 = arith.maximumf %281, %300 : vector<1x128xf32>
    %302 = arith.addf %282, %300 : vector<1x128xf32>
    %c60 = arith.constant 60 : index
    %303 = memref.load %arg0[%c60] : memref<64xf32, #tpu.memory_space<smem>>
    %c61 = arith.constant 61 : index
    %304 = memref.load %arg0[%c61] : memref<64xf32, #tpu.memory_space<smem>>
    %c62 = arith.constant 62 : index
    %305 = memref.load %arg0[%c62] : memref<64xf32, #tpu.memory_space<smem>>
    %c63 = arith.constant 63 : index
    %306 = memref.load %arg0[%c63] : memref<64xf32, #tpu.memory_space<smem>>
    %307 = vector.broadcast %303 : f32 to vector<1x128xf32>
    %308 = arith.mulf %307, %0 : vector<1x128xf32>
    %309 = arith.addf %4, %308 : vector<1x128xf32>
    %310 = vector.broadcast %304 : f32 to vector<1x128xf32>
    %311 = arith.mulf %310, %1 : vector<1x128xf32>
    %312 = arith.addf %309, %311 : vector<1x128xf32>
    %313 = vector.broadcast %305 : f32 to vector<1x128xf32>
    %314 = arith.mulf %313, %2 : vector<1x128xf32>
    %315 = arith.addf %312, %314 : vector<1x128xf32>
    %316 = vector.broadcast %306 : f32 to vector<1x128xf32>
    %317 = arith.mulf %316, %3 : vector<1x128xf32>
    %318 = arith.addf %315, %317 : vector<1x128xf32>
    %cst_27 = arith.constant 0.000000e+00 : f32
    %319 = vector.broadcast %cst_27 : f32 to vector<1x128xf32>
    %320 = arith.maximumf %318, %319 : vector<1x128xf32>
    %321 = arith.maximumf %301, %320 : vector<1x128xf32>
    %322 = arith.addf %302, %320 : vector<1x128xf32>
    %cst_28 = arith.constant 2.500000e-01 : f32
    %323 = vector.broadcast %cst_28 : f32 to vector<1x128xf32>
    %324 = arith.mulf %322, %323 : vector<1x128xf32>
    %325 = tpu.concatenate %81, %161 in 0 : vector<1x128xf32>, vector<1x128xf32> -> vector<2x128xf32>
    %326 = tpu.concatenate %84, %164 in 0 : vector<1x128xf32>, vector<1x128xf32> -> vector<2x128xf32>
    %327 = tpu.concatenate %241, %321 in 0 : vector<1x128xf32>, vector<1x128xf32> -> vector<2x128xf32>
    %328 = tpu.concatenate %244, %324 in 0 : vector<1x128xf32>, vector<1x128xf32> -> vector<2x128xf32>
    %329 = arith.subf %325, %327 : vector<2x128xf32>
    %330 = math.absf %329 : vector<2x128xf32>
    %331 = arith.subf %326, %328 : vector<2x128xf32>
    %332 = math.absf %331 : vector<2x128xf32>
    %333 = arith.mulf %325, %327 : vector<2x128xf32>
    %334 = arith.mulf %326, %328 : vector<2x128xf32>
    %c0_29 = arith.constant 0 : index
    %c0_30 = arith.constant 0 : index
    %335 = vector.load %arg3[%c0_29, %c0_30] : memref<16x128xf32, #tpu.memory_space<vmem>>, vector<1x128xf32>
    %336 = vector.broadcast %335 : vector<1x128xf32> to vector<2x128xf32>
    %337 = arith.mulf %325, %336 : vector<2x128xf32>
    %c1_31 = arith.constant 1 : index
    %c0_32 = arith.constant 0 : index
    %338 = vector.load %arg3[%c1_31, %c0_32] : memref<16x128xf32, #tpu.memory_space<vmem>>, vector<1x128xf32>
    %339 = vector.broadcast %338 : vector<1x128xf32> to vector<2x128xf32>
    %340 = arith.mulf %326, %339 : vector<2x128xf32>
    %341 = arith.addf %337, %340 : vector<2x128xf32>
    %c2_33 = arith.constant 2 : index
    %c0_34 = arith.constant 0 : index
    %342 = vector.load %arg3[%c2_33, %c0_34] : memref<16x128xf32, #tpu.memory_space<vmem>>, vector<1x128xf32>
    %343 = vector.broadcast %342 : vector<1x128xf32> to vector<2x128xf32>
    %344 = arith.mulf %327, %343 : vector<2x128xf32>
    %345 = arith.addf %341, %344 : vector<2x128xf32>
    %c3_35 = arith.constant 3 : index
    %c0_36 = arith.constant 0 : index
    %346 = vector.load %arg3[%c3_35, %c0_36] : memref<16x128xf32, #tpu.memory_space<vmem>>, vector<1x128xf32>
    %347 = vector.broadcast %346 : vector<1x128xf32> to vector<2x128xf32>
    %348 = arith.mulf %328, %347 : vector<2x128xf32>
    %349 = arith.addf %345, %348 : vector<2x128xf32>
    %c4_37 = arith.constant 4 : index
    %c0_38 = arith.constant 0 : index
    %350 = vector.load %arg3[%c4_37, %c0_38] : memref<16x128xf32, #tpu.memory_space<vmem>>, vector<1x128xf32>
    %351 = vector.broadcast %350 : vector<1x128xf32> to vector<2x128xf32>
    %352 = arith.mulf %330, %351 : vector<2x128xf32>
    %353 = arith.addf %349, %352 : vector<2x128xf32>
    %c5_39 = arith.constant 5 : index
    %c0_40 = arith.constant 0 : index
    %354 = vector.load %arg3[%c5_39, %c0_40] : memref<16x128xf32, #tpu.memory_space<vmem>>, vector<1x128xf32>
    %355 = vector.broadcast %354 : vector<1x128xf32> to vector<2x128xf32>
    %356 = arith.mulf %332, %355 : vector<2x128xf32>
    %357 = arith.addf %353, %356 : vector<2x128xf32>
    %c6_41 = arith.constant 6 : index
    %c0_42 = arith.constant 0 : index
    %358 = vector.load %arg3[%c6_41, %c0_42] : memref<16x128xf32, #tpu.memory_space<vmem>>, vector<1x128xf32>
    %359 = vector.broadcast %358 : vector<1x128xf32> to vector<2x128xf32>
    %360 = arith.mulf %333, %359 : vector<2x128xf32>
    %361 = arith.addf %357, %360 : vector<2x128xf32>
    %c7_43 = arith.constant 7 : index
    %c0_44 = arith.constant 0 : index
    %362 = vector.load %arg3[%c7_43, %c0_44] : memref<16x128xf32, #tpu.memory_space<vmem>>, vector<1x128xf32>
    %363 = vector.broadcast %362 : vector<1x128xf32> to vector<2x128xf32>
    %364 = arith.mulf %334, %363 : vector<2x128xf32>
    %365 = arith.addf %361, %364 : vector<2x128xf32>
    %cst_45 = arith.constant dense<0.000000e+00> : vector<2xf32>
    %366 = vector.multi_reduction <add>, %365, %cst_45 [1] : vector<2x128xf32> to vector<2xf32>
    %367 = vector.shape_cast %366 : vector<2xf32> to vector<2x1xf32>
    %c0_46 = arith.constant 0 : index
    %368 = memref.load %arg4[%c0_46] : memref<2xf32, #tpu.memory_space<smem>>
    %369 = vector.broadcast %368 : f32 to vector<2x1xf32>
    %370 = arith.addf %367, %369 : vector<2x1xf32>
    %c0_47 = arith.constant 0 : index
    %c0_48 = arith.constant 0 : index
    %371 = vector.load %arg5[%c0_47, %c0_48] : memref<2x2xf32, #tpu.memory_space<vmem>>, vector<2x1xf32>
    tpu.vector_store %arg5[%c0_47, %c0_48], %370 {strides = array<i32>} : memref<2x2xf32, #tpu.memory_space<vmem>>, vector<2x1xf32>,
    %c8_49 = arith.constant 8 : index
    %c0_50 = arith.constant 0 : index
    %372 = vector.load %arg3[%c8_49, %c0_50] : memref<16x128xf32, #tpu.memory_space<vmem>>, vector<1x128xf32>
    %373 = vector.broadcast %372 : vector<1x128xf32> to vector<2x128xf32>
    %374 = arith.mulf %325, %373 : vector<2x128xf32>
    %c9_51 = arith.constant 9 : index
    %c0_52 = arith.constant 0 : index
    %375 = vector.load %arg3[%c9_51, %c0_52] : memref<16x128xf32, #tpu.memory_space<vmem>>, vector<1x128xf32>
    %376 = vector.broadcast %375 : vector<1x128xf32> to vector<2x128xf32>
    %377 = arith.mulf %326, %376 : vector<2x128xf32>
    %378 = arith.addf %374, %377 : vector<2x128xf32>
    %c10_53 = arith.constant 10 : index
    %c0_54 = arith.constant 0 : index
    %379 = vector.load %arg3[%c10_53, %c0_54] : memref<16x128xf32, #tpu.memory_space<vmem>>, vector<1x128xf32>
    %380 = vector.broadcast %379 : vector<1x128xf32> to vector<2x128xf32>
    %381 = arith.mulf %327, %380 : vector<2x128xf32>
    %382 = arith.addf %378, %381 : vector<2x128xf32>
    %c11_55 = arith.constant 11 : index
    %c0_56 = arith.constant 0 : index
    %383 = vector.load %arg3[%c11_55, %c0_56] : memref<16x128xf32, #tpu.memory_space<vmem>>, vector<1x128xf32>
    %384 = vector.broadcast %383 : vector<1x128xf32> to vector<2x128xf32>
    %385 = arith.mulf %328, %384 : vector<2x128xf32>
    %386 = arith.addf %382, %385 : vector<2x128xf32>
    %c12_57 = arith.constant 12 : index
    %c0_58 = arith.constant 0 : index
    %387 = vector.load %arg3[%c12_57, %c0_58] : memref<16x128xf32, #tpu.memory_space<vmem>>, vector<1x128xf32>
    %388 = vector.broadcast %387 : vector<1x128xf32> to vector<2x128xf32>
    %389 = arith.mulf %330, %388 : vector<2x128xf32>
    %390 = arith.addf %386, %389 : vector<2x128xf32>
    %c13_59 = arith.constant 13 : index
    %c0_60 = arith.constant 0 : index
    %391 = vector.load %arg3[%c13_59, %c0_60] : memref<16x128xf32, #tpu.memory_space<vmem>>, vector<1x128xf32>
    %392 = vector.broadcast %391 : vector<1x128xf32> to vector<2x128xf32>
    %393 = arith.mulf %332, %392 : vector<2x128xf32>
    %394 = arith.addf %390, %393 : vector<2x128xf32>
    %c14_61 = arith.constant 14 : index
    %c0_62 = arith.constant 0 : index
    %395 = vector.load %arg3[%c14_61, %c0_62] : memref<16x128xf32, #tpu.memory_space<vmem>>, vector<1x128xf32>
    %396 = vector.broadcast %395 : vector<1x128xf32> to vector<2x128xf32>
    %397 = arith.mulf %333, %396 : vector<2x128xf32>
    %398 = arith.addf %394, %397 : vector<2x128xf32>
    %c15_63 = arith.constant 15 : index
    %c0_64 = arith.constant 0 : index
    %399 = vector.load %arg3[%c15_63, %c0_64] : memref<16x128xf32, #tpu.memory_space<vmem>>, vector<1x128xf32>
    %400 = vector.broadcast %399 : vector<1x128xf32> to vector<2x128xf32>
    %401 = arith.mulf %334, %400 : vector<2x128xf32>
    %402 = arith.addf %398, %401 : vector<2x128xf32>
    %cst_65 = arith.constant dense<0.000000e+00> : vector<2xf32>
    %403 = vector.multi_reduction <add>, %402, %cst_65 [1] : vector<2x128xf32> to vector<2xf32>
    %404 = vector.shape_cast %403 : vector<2xf32> to vector<2x1xf32>
    %c1_66 = arith.constant 1 : index
    %405 = memref.load %arg4[%c1_66] : memref<2xf32, #tpu.memory_space<smem>>
    %406 = vector.broadcast %405 : f32 to vector<2x1xf32>
    %407 = arith.addf %404, %406 : vector<2x1xf32>
    %c0_67 = arith.constant 0 : index
    %c1_68 = arith.constant 1 : index
    %408 = vector.load %arg5[%c0_67, %c1_68] : memref<2x2xf32, #tpu.memory_space<vmem>>, vector<2x1xf32>
    tpu.vector_store %arg5[%c0_67, %c1_68], %407 {strides = array<i32>} : memref<2x2xf32, #tpu.memory_space<vmem>>, vector<2x1xf32>,
    return
  }
}

</mosaic_0001>

<bundles_post_ra>
// kernel: siamese_cnn_forward.1
= control target key start
LH: loop header
LB: loop body
LE: loop exit
PB: predicated region body
PF: predicated region fallthrough
CT: control target
= control target key end

     0   :  { %10 = vsyncpa [#allocation4], 0  ;;  %s998_s0 = inlined_call_operand.vmem [shape: f32[64], index: 0, kind: input, shape index: {}]   ;;  %s999_s1 = inlined_call_operand.vmem [shape: f32[4,128], index: 1, kind: input, shape index: {}]   ;;  %s1000_s2 = inlined_call_operand.vmem [shape: f32[1,128], index: 2, kind: input, shape index: {}]   ;;  %s1001_s3 = inlined_call_operand.vmem [shape: f32[16,128], index: 3, kind: input, shape index: {}]   ;;  %s1002_s4 = inlined_call_operand.vmem [shape: f32[2], index: 4, kind: input, shape index: {}]   ;;  %s1003_s5 = inlined_call_operand.hbm [shape: f32[2,2], index: 5, kind: output, shape index: {}]  }
   0x1   :  { %11 = vsyncpa [#allocation6], 0 }
   0x2   :  { %12 = vsyncpa [#allocation3], 0  ;;  %s18_s20 = sshll.u32 %s998_s0, 4  ;;  %s33_s23 = sshll.u32 %s1002_s4, 4  ;;  %s19_s20 = int_to_ptr.vmem [resolvable:$true] %s18_s20  ;;  %s34_s23 = int_to_ptr.vmem [resolvable:$true] %s33_s23 }
   0x3   :  { %s608_s24 = smov [#allocation2]   ;;  %s609_s25 = smov [#allocation5]  }
   0x4   :  { %21 = dma.vmem_to_smem %s19_s20, 16, %s608_s24, [#allocation4]  }
   0x5   :  { %36 = dma.vmem_to_smem %s34_s23, 16, %s609_s25, [#allocation6]  }
   0x6   :  { %602 = dma.done.wait [#allocation4], 16  }
   0x7   :  { %603 = vsyncadd [#allocation4], 4294967280 }
   0x8   :  { %604 = dma.done.wait [#allocation6], 16  }
   0x9   :  { %605 = vsyncadd [#allocation6], 4294967280 }
   0xa   :  { %45 = sfence }
   0xb   :  { %s51_s26 = sld [smem:[#allocation2]]  ;;  %v652_v0 = vld [vmem:[%s999_s1] sm:$0x1]  ;;  %v657_v1 = vld [vmem:[%s999_s1 + $0x1] sm:$0x1]  ;;  %vm354_vm0 = vcmask 1040384  }
   0xc   :  { %s471_s27 = sld [smem:[#allocation2 + $0x1]]  ;;  %v662_v2 = vld [vmem:[%s1000_s2] sm:$0x1]  ;;  %v683_v12 = vld [vmem:[%s999_s1 + $0x2] sm:$0x1]  ;;  %vm405_vm1 = vcmask 1041408  }
   0xd   :  { %s472_s28 = sld [smem:[#allocation2 + $0x2]]  ;;  %v701_v19 = vld [vmem:[%s999_s1 + $0x3] sm:$0x1]  ;;  %vm412_vm2 = vcmask 1024   ;;  %vm451_vm3 = vcmask 9224  }
   0xe   :  { %s647_s29 = sld [smem:[#allocation2 + $0x3]] }
   0xf   :  { %s474_s4 = sld [smem:[#allocation2 + $0x4]] }
  0x10   :  { %s475_s6 = sld [smem:[#allocation2 + $0x5]] }
  0x11   :  { %v55_v3 = vstv %s51_s26  ;;  %s664_s11 = sld [smem:[#allocation2 + $0x6]] }
  0x12   :  { %v56_v4 = vmul.f32 %v55_v3, %v652_v0  ;;  %v58_v5 = vstv %s471_s27  ;;  %s667_s12 = sld [smem:[#allocation2 + $0x7]] }
  0x13   :  { %s669_s13 = sld [smem:[#allocation2 + $0x8]]  ;;  %v59_v7 = vmul.f32 %v58_v5, %v657_v1  ;;  %v61_v8 = vstv %s472_s28 }
  0x14   :  { %v57_v6 = vadd.f32 %v56_v4, %v662_v2  ;;  %s673_s14 = sld [smem:[#allocation2 + $0x9]]  ;;  %v62_v14 = vmul.f32 %v61_v8, %v683_v12  ;;  %v64_v17 = vstv %s647_s29 }
  0x15   :  { %v72_v9 = vstv %s474_s4  ;;  %s675_s2 = sld [smem:[#allocation2 + $0xa]]  ;;  %v65_v22 = vmul.f32 %v64_v17, %v701_v19 }
  0x16   :  { %v73_v10 = vmul.f32 %v72_v9, %v652_v0  ;;  %v75_v11 = vstv %s475_s6  ;;  %s678_s15 = sld [smem:[#allocation2 + $0xb]]  ;;  %v60_v13 = vadd.f32 %v59_v7, %v57_v6 }
  0x17   :  { %s685_s18 = sld [smem:[#allocation2 + $0xc]]  ;;  %v76_v16 = vmul.f32 %v75_v11, %v657_v1  ;;  %v78_v18 = vstv %s664_s11 }
  0x18   :  { %v74_v15 = vadd.f32 %v73_v10, %v662_v2  ;;  %s690_s19 = sld [smem:[#allocation2 + $0xd]]  ;;  %v63_v21 = vadd.f32 %v62_v14, %v60_v13  ;;  %v79_v24 = vmul.f32 %v78_v18, %v683_v12  ;;  %v81_v25 = vstv %s667_s12 }
  0x19   :  { %s694_s20 = sld [smem:[#allocation2 + $0xe]]  ;;  %v91_v20 = vstv %s669_s13  ;;  %v82_v30 = vmul.f32 %v81_v25, %v701_v19 }
  0x1a   :  { %s696_s21 = sld [smem:[#allocation2 + $0xf]]  ;;  %v77_v23 = vadd.f32 %v76_v16, %v74_v15  ;;  %v92_v26 = vmul.f32 %v91_v20, %v652_v0  ;;  %v94_v27 = vstv %s673_s14  ;;  %v715_v28 = vadd.f32 %v65_v22, %v63_v21 }
  0x1b   :  { %s486_s24 = sld [smem:[#allocation2 + $0x10]]  ;;  %v95_v33 = vmul.f32 %v94_v27, %v657_v1  ;;  %v97_v34 = vstv %s675_s2 }
  0x1c   :  { %s487_s25 = sld [smem:[#allocation2 + $0x11]]  ;;  %v80_v29 = vadd.f32 %v79_v24, %v77_v23  ;;  %v93_v32 = vadd.f32 %v92_v26, %v662_v2  ;;  %v100_v35 = vstv %s678_s15  ;;  %v67_v39 = vmax.f32 %v715_v28, 0.0 }
  0x1d   :  { %s707_s26 = sld [smem:[#allocation2 + $0x12]]  ;;  %v110_v36 = vstv %s685_s18  ;;  %v98_v42 = vmul.f32 %v97_v34, %v683_v12  ;;  %v101_v47 = vmul.f32 %v100_v35, %v701_v19 }
  0x1e   :  { %s710_s27 = sld [smem:[#allocation2 + $0x13]]  ;;  %v733_v40 = vadd.f32 %v82_v30, %v80_v29  ;;  %v96_v46 = vadd.f32 %v95_v33, %v93_v32  ;;  %v111_v48 = vmul.f32 %v110_v36, %v652_v0  ;;  %v113_v49 = vstv %s690_s19 }
  0x1f   :  { %s713_s1 = sld [smem:[#allocation2 + $0x14]]  ;;  %v116_v50 = vstv %s694_s20  ;;  %v114_v9 = vmul.f32 %v113_v49, %v657_v1 }
  0x20   :  { %s718_s28 = sld [smem:[#allocation2 + $0x15]]  ;;  %v84_v54 = vmax.f32 %v733_v40, 0.0  ;;  %v99_v62 = vadd.f32 %v98_v42, %v96_v46  ;;  %v112_v5 = vadd.f32 %v111_v48, %v662_v2  ;;  %v117_v23 = vmul.f32 %v116_v50, %v683_v12 }
  0x21   :  { %v130_v31 = vstv %s486_s24  ;;  %s720_s29 = sld [smem:[#allocation2 + $0x16]]  ;;  %v119_v24 = vstv %s696_s21 }
  0x22   :  { %s725_s0 = sld [smem:[#allocation2 + $0x17]]  ;;  %v131_v37 = vmul.f32 %v130_v31, %v652_v0  ;;  %v133_v38 = vstv %s487_s25  ;;  %v797_v27 = vadd.f32 %v101_v47, %v99_v62  ;;  %v115_v29 = vadd.f32 %v114_v9, %v112_v5 }
  0x23   :  { %s730_s30 = sld [smem:[#allocation2 + $0x18]]  ;;  %v134_v41 = vmul.f32 %v133_v38, %v657_v1  ;;  %v136_v44 = vstv %s707_s26  ;;  %v86_v42 = vadd.f32 %v84_v54, %v67_v39 }
  0x24   :  { %s736_s4 = sld [smem:[#allocation2 + $0x19]]  ;;  %v132_v43 = vadd.f32 %v131_v37, %v662_v2  ;;  %v137_v56 = vmul.f32 %v136_v44, %v683_v12  ;;  %v139_v58 = vstv %s710_s27  ;;  %v118_v44 = vadd.f32 %v117_v23, %v115_v29 }
  0x25   :  { %v147_v45 = vstv %s713_s1  ;;  %s742_s6 = sld [smem:[#allocation2 + $0x1a]]  ;;  %v140_v11 = vmul.f32 %v139_v58, %v701_v19  ;;  %v103_v48 = vmax.f32 %v797_v27, 0.0 }
  0x26   :  { %s747_s7 = sld [smem:[#allocation2 + $0x1b]]  ;;  %v148_v51 = vmul.f32 %v147_v45, %v652_v0  ;;  %v150_v52 = vstv %s718_s28  ;;  %v135_v55 = vadd.f32 %v134_v41, %v132_v43  ;;  %v85_v41 = vmax.f32 %v67_v39, %v84_v54 }
  0x27   :  { %v153_v53 = vstv %s720_s29  ;;  %s753_s8 = sld [smem:[#allocation2 + $0x1c]]  ;;  %v151_v57 = vmul.f32 %v150_v52, %v657_v1  ;;  %v120_v45 = vmul.f32 %v119_v24, %v701_v19  ;;  %v105_v27 = vadd.f32 %v103_v48, %v86_v42 }
  0x28   :  { %s758_s9 = sld [smem:[#allocation2 + $0x1d]]  ;;  %v149_v59 = vadd.f32 %v148_v51, %v662_v2  ;;  %v154_v60 = vmul.f32 %v153_v53, %v683_v12  ;;  %v156_v63 = vstv %s725_s0  ;;  %v138_v10 = vadd.f32 %v137_v56, %v135_v55 }
  0x29   :  { %v166_v61 = vstv %s730_s30  ;;  %s764_s10 = sld [smem:[#allocation2 + $0x1e]]  ;;  %v157_v15 = vmul.f32 %v156_v63, %v701_v19  ;;  %v831_v54 = vmax.f32 %v85_v41, %v103_v48  ;;  %v838_v58 = vadd.f32 %v120_v45, %v118_v44 }
  0x2a   :  { %v167_v3 = vmul.f32 %v166_v61, %v652_v0  ;;  %v169_v4 = vstv %s736_s4  ;;  %s769_s11 = sld [smem:[#allocation2 + $0x1f]]  ;;  %v152_v6 = vadd.f32 %v151_v57, %v149_v59  ;;  %v141_v30 = vadd.f32 %v140_v11, %v138_v10 }
  0x2b   :  { %v170_v7 = vmul.f32 %v169_v4, %v657_v1  ;;  %v172_v8 = vstv %s742_s6  ;;  %s774_s12 = sld [smem:[#allocation2 + $0x20]] }
  0x2c   :  { %v168_v13 = vadd.f32 %v167_v3, %v662_v2  ;;  %s779_s13 = sld [smem:[#allocation2 + $0x21]]  ;;  %v155_v14 = vadd.f32 %v154_v60, %v152_v6  ;;  %v173_v16 = vmul.f32 %v172_v8, %v683_v12  ;;  %v175_v20 = vstv %s747_s7 }
  0x2d   :  { %v185_v17 = vstv %s753_s8  ;;  %s784_s14 = sld [smem:[#allocation2 + $0x22]]  ;;  %v176_v34 = vmul.f32 %v175_v20, %v701_v19  ;;  %v142_v49 = vmax.f32 %v141_v30, 0.0 }
  0x2e   :  { %v171_v18 = vadd.f32 %v170_v7, %v168_v13  ;;  %v186_v21 = vmul.f32 %v185_v17, %v652_v0  ;;  %v188_v22 = vstv %s758_s9  ;;  %s789_s2 = sld [smem:[#allocation2 + $0x23]]  ;;  %v158_v32 = vadd.f32 %v157_v15, %v155_v14 }
  0x2f   :  { %v189_v25 = vmul.f32 %v188_v22, %v657_v1  ;;  %v191_v26 = vstv %s764_s10  ;;  %s795_s15 = sld [smem:[#allocation2 + $0x24]] }
  0x30   :  { %v187_v31 = vadd.f32 %v186_v21, %v662_v2  ;;  %s800_s16 = sld [smem:[#allocation2 + $0x25]]  ;;  %v174_v33 = vadd.f32 %v173_v16, %v171_v18  ;;  %v192_v37 = vmul.f32 %v191_v26, %v683_v12  ;;  %v194_v43 = vstv %s769_s11 }
  0x31   :  { %v205_v35 = vstv %s774_s12  ;;  %s804_s17 = sld [smem:[#allocation2 + $0x26]]  ;;  %v159_v39 = vmax.f32 %v158_v32, 0.0  ;;  %v195_v53 = vmul.f32 %v194_v43, %v701_v19  ;;  %v122_v32 = vmax.f32 %v838_v58, 0.0  ;;  %v539_v58 = vld [vmem:[%s1001_s3 + $0x1] ss:$0 sm:$0xff] }
  0x32   :  { %v190_v36 = vadd.f32 %v189_v25, %v187_v31  ;;  %v206_v38 = vmul.f32 %v205_v35, %v652_v0  ;;  %v208_v40 = vstv %s779_s13  ;;  %s809_s18 = sld [smem:[#allocation2 + $0x27]]  ;;  %v177_v51 = vadd.f32 %v176_v34, %v174_v33 }
  0x33   :  { %s816_s19 = sld [smem:[#allocation2 + $0x28]]  ;;  %v209_v47 = vmul.f32 %v208_v40, %v657_v1  ;;  %v211_v50 = vstv %s784_s14  ;;  %v161_v5 = vadd.f32 %v159_v39, %v142_v49  ;;  %v160_v9 = vmax.f32 %v142_v49, %v159_v39 }
  0x34   :  { %v207_v46 = vadd.f32 %v206_v38, %v662_v2  ;;  %s821_s20 = sld [smem:[#allocation2 + $0x29]]  ;;  %v193_v52 = vadd.f32 %v192_v37, %v190_v36  ;;  %v212_v60 = vmul.f32 %v211_v50, %v683_v12  ;;  %v214_v62 = vstv %s789_s2 }
  0x35   :  { %v222_v28 = vstv %s795_s15  ;;  %s826_s21 = sld [smem:[#allocation2 + $0x2a]]  ;;  %v178_v6 = vmax.f32 %v177_v51, 0.0  ;;  %v215_v15 = vmul.f32 %v214_v62, %v701_v19 }
  0x36   :  { %s829_s22 = sld [smem:[#allocation2 + $0x2b]]  ;;  %v223_v55 = vmul.f32 %v222_v28, %v652_v0  ;;  %v225_v56 = vstv %s800_s16  ;;  %v210_v59 = vadd.f32 %v209_v47, %v207_v46  ;;  %v850_v7 = vadd.f32 %v195_v53, %v193_v52 }
  0x37   :  { %v228_v57 = vstv %s804_s17  ;;  %s836_s23 = sld [smem:[#allocation2 + $0x2c]]  ;;  %v226_v61 = vmul.f32 %v225_v56, %v657_v1  ;;  %v180_v23 = vadd.f32 %v178_v6, %v161_v5  ;;  %v179_v36 = vmax.f32 %v160_v9, %v178_v6 }
  0x38   :  { %s842_s24 = sld [smem:[#allocation2 + $0x2d]]  ;;  %v224_v63 = vadd.f32 %v223_v55, %v662_v2  ;;  %v229_v3 = vmul.f32 %v228_v57, %v683_v12  ;;  %v231_v8 = vstv %s809_s18  ;;  %v213_v14 = vadd.f32 %v212_v60, %v210_v59 }
  0x39   :  { %v241_v4 = vstv %s816_s19  ;;  %s848_s25 = sld [smem:[#allocation2 + $0x2e]]  ;;  %v232_v20 = vmul.f32 %v231_v8, %v701_v19  ;;  %v197_v24 = vmax.f32 %v850_v7, 0.0  ;;  %v124_v8 = vadd.f32 %v122_v32, %v105_v27  ;;  %s610_s19 = smov [#allocation7]  }
  0x3a   :  { %s853_s26 = sld [smem:[#allocation2 + $0x2f]]  ;;  %v227_v10 = vadd.f32 %v226_v61, %v224_v63  ;;  %v242_v11 = vmul.f32 %v241_v4, %v652_v0  ;;  %v244_v13 = vstv %s821_s20  ;;  %v884_v37 = vadd.f32 %v215_v15, %v213_v14 }
  0x3b   :  { %s857_s27 = sld [smem:[#allocation2 + $0x30]]  ;;  %v245_v16 = vmul.f32 %v244_v13, %v657_v1  ;;  %v247_v17 = vstv %s826_s21  ;;  %v199_v41 = vadd.f32 %v197_v24, %v180_v23  ;;  %v198_v9 = vmax.f32 %v179_v36, %v197_v24 }
  0x3c   :  { %s862_s1 = sld [smem:[#allocation2 + $0x31]]  ;;  %v230_v18 = vadd.f32 %v229_v3, %v227_v10  ;;  %v243_v21 = vadd.f32 %v242_v11, %v662_v2  ;;  %v248_v30 = vmul.f32 %v247_v17, %v683_v12  ;;  %v250_v31 = vstv %s829_s22  ;;  %s460_s22 = sshll.u32 %s1003_s5, 4  ;;  %s461_s22 = int_to_ptr.hbm [resolvable:$true] %s460_s22 }
  0x3d   :  { %v260_v22 = vstv %s836_s23  ;;  %s867_s28 = sld [smem:[#allocation2 + $0x32]]  ;;  %v251_v42 = vmul.f32 %v250_v31, %v701_v19  ;;  %v217_v51 = vmax.f32 %v884_v37, 0.0  ;;  %v200_v13 = vmul.f32 0.25, %v199_v41 }
  0x3e   :  { %v261_v25 = vmul.f32 %v260_v22, %v652_v0  ;;  %v263_v26 = vstv %s842_s24  ;;  %s872_s29 = sld [smem:[#allocation2 + $0x33]]  ;;  %v246_v29 = vadd.f32 %v245_v16, %v243_v21  ;;  %v886_v38 = vadd.f32 %v232_v20, %v230_v18 }
  0x3f   :  { %s876_s0 = sld [smem:[#allocation2 + $0x34]]  ;;  %v264_v34 = vmul.f32 %v263_v26, %v657_v1  ;;  %v266_v35 = vstv %s848_s25 }
  0x40   :  { %v262_v33 = vadd.f32 %v261_v25, %v662_v2  ;;  %s882_s30 = sld [smem:[#allocation2 + $0x35]]  ;;  %v249_v45 = vadd.f32 %v248_v30, %v246_v29  ;;  %v267_v46 = vmul.f32 %v266_v35, %v683_v12  ;;  %v269_v47 = vstv %s853_s26 }
  0x41   :  { %v280_v40 = vstv %s857_s27  ;;  %s889_s4 = sld [smem:[#allocation2 + $0x36]]  ;;  %v234_v52 = vmax.f32 %v886_v38, 0.0  ;;  %v270_v62 = vmul.f32 %v269_v47, %v701_v19 }
  0x42   :  { %v281_v43 = vmul.f32 %v280_v40, %v652_v0  ;;  %v283_v44 = vstv %s862_s1  ;;  %s894_s6 = sld [smem:[#allocation2 + $0x37]]  ;;  %v265_v49 = vadd.f32 %v264_v34, %v262_v33  ;;  %v252_v61 = vadd.f32 %v251_v42, %v249_v45 }
  0x43   :  { %v284_v48 = vmul.f32 %v283_v44, %v657_v1  ;;  %s899_s7 = sld [smem:[#allocation2 + $0x38]]  ;;  %v286_v28 = vstv %s867_s28  ;;  %v236_v14 = vadd.f32 %v234_v52, %v217_v51  ;;  %v123_v45 = vmax.f32 %v831_v54, %v122_v32  ;;  %v538_v54 = vld [vmem:[%s1001_s3] ss:$0 sm:$0xff] }
  0x44   :  { %v282_v50 = vadd.f32 %v281_v43, %v662_v2  ;;  %v289_v39 = vstv %s872_s29  ;;  %s904_s8 = sld [smem:[#allocation2 + $0x39]]  ;;  %v287_v53 = vmul.f32 %v286_v28, %v683_v12  ;;  %v268_v4 = vadd.f32 %v267_v46, %v265_v49 }
  0x45   :  { %v297_v55 = vstv %s876_s0  ;;  %s910_s9 = sld [smem:[#allocation2 + $0x3a]]  ;;  %v290_v57 = vmul.f32 %v289_v39, %v701_v19  ;;  %v253_v22 = vmax.f32 %v252_v61, 0.0  ;;  %v125_v46 = vmul.f32 0.25, %v124_v8 }
  0x46   :  { %v285_v56 = vadd.f32 %v284_v48, %v282_v50  ;;  %v298_v59 = vmul.f32 %v297_v55, %v652_v0  ;;  %v300_v60 = vstv %s882_s30  ;;  %s915_s10 = sld [smem:[#allocation2 + $0x3b]]  ;;  %v271_v23 = vadd.f32 %v270_v62, %v268_v4 }
  0x47   :  { %v301_v63 = vmul.f32 %v300_v60, %v657_v1  ;;  %v303_v3 = vstv %s889_s4  ;;  %s530_s11 = sld [smem:[#allocation2 + $0x3c]]  ;;  %v235_v47 = vmax.f32 %v217_v51, %v234_v52  ;;  %v352_v50 = vperm.slane %v198_v9, 0  ;;  %v546_v52 = vld [vmem:[%s1001_s3 + $0x8] ss:$0 sm:$0xff] }
  0x48   :  { %v288_v5 = vadd.f32 %v287_v53, %v285_v56  ;;  %v299_v6 = vadd.f32 %v298_v59, %v662_v2  ;;  %v304_v7 = vmul.f32 %v303_v3, %v683_v12  ;;  %s531_s12 = sld [smem:[#allocation2 + $0x3d]]  ;;  %v306_v10 = vstv %s894_s6  ;;  %v547_v59 = vld [vmem:[%s1001_s3 + $0x9] ss:$0 sm:$0xff] }
  0x49   :  { %v316_v11 = vstv %s899_s7  ;;  %s532_s13 = sld [smem:[#allocation2 + $0x3e]]  ;;  %v307_v17 = vmul.f32 %v306_v10, %v701_v19  ;;  %v357_v28 = vperm.slane %v200_v13, 0  ;;  %v272_v55 = vmax.f32 %v271_v23, 0.0  ;;  %v540_v10 = vld [vmem:[%s1001_s3 + $0x2] ss:$0 sm:$0xff] }
  0x4a   :  { %v291_v15 = vadd.f32 %v290_v57, %v288_v5  ;;  %v302_v16 = vadd.f32 %v301_v63, %v299_v6  ;;  %s533_s14 = sld [smem:[#allocation2 + $0x3f]]  ;;  %v317_v18 = vmul.f32 %v316_v11, %v652_v0  ;;  %v319_v20 = vstv %s904_s8  ;;  %v548_v11 = vld [vmem:[%s1001_s3 + $0xa] ss:$0 sm:$0xff] }
  0x4b   :  { %v322_v21 = vstv %s910_s9  ;;  %v320_v24 = vmul.f32 %v319_v20, %v657_v1  ;;  %v254_v56 = vmax.f32 %v235_v47, %v253_v22  ;;  %v355_v32 = vsel %vm354_vm0, %v123_v45, %v352_v50  ;;  %v541_v20 = vld [vmem:[%s1001_s3 + $0x3] ss:$0 sm:$0xff]  ;;  %v545_v47 = vld [vmem:[%s1001_s3 + $0x7] ss:$0 sm:$0xff]  ;;  %s409_s17 = sld [smem:[#allocation5]] }
  0x4c   :  { %v305_v25 = vadd.f32 %v304_v7, %v302_v16  ;;  %v318_v26 = vadd.f32 %v317_v18, %v662_v2  ;;  %v323_v27 = vmul.f32 %v322_v21, %v683_v12  ;;  %v325_v29 = vstv %s915_s10  ;;  %s534_s18 = sld [smem:[#allocation5 + $0x1]] }
  0x4d   :  { %v335_v30 = vstv %s530_s11  ;;  %v292_v31 = vmax.f32 %v291_v15, 0.0  ;;  %v326_v37 = vmul.f32 %v325_v29, %v701_v19  ;;  %v359_v51 = vsel %vm354_vm0, %v125_v46, %v357_v28 }
  0x4e   :  { %v308_v33 = vadd.f32 %v307_v17, %v305_v25  ;;  %v336_v34 = vmul.f32 %v335_v30, %v652_v0  ;;  %v338_v35 = vstv %s531_s12  ;;  %v321_v36 = vadd.f32 %v320_v24, %v318_v26  ;;  %v542_v24 = vld [vmem:[%s1001_s3 + $0x4] ss:$0 sm:$0xff] }
  0x4f   :  { %v339_v38 = vmul.f32 %v338_v35, %v657_v1  ;;  %v341_v40 = vstv %s532_s13  ;;  %v273_v3 = vmax.f32 %v254_v56, %v272_v55  ;;  %v376_v4 = vmul.f32 %v538_v54, %v355_v32  ;;  %v551_v35 = vld [vmem:[%s1001_s3 + $0xd] ss:$0 sm:$0xff]  ;;  %v553_v56 = vld [vmem:[%s1001_s3 + $0xf] ss:$0 sm:$0xff] }
  0x50   :  { %v309_v41 = vmax.f32 %v308_v33, 0.0  ;;  %v337_v42 = vadd.f32 %v336_v34, %v662_v2  ;;  %v342_v43 = vmul.f32 %v341_v40, %v683_v12  ;;  %v344_v44 = vstv %s533_s14  ;;  %v543_v34 = vld [vmem:[%s1001_s3 + $0x5] ss:$0 sm:$0xff] }
  0x51   :  { %v324_v0 = vadd.f32 %v323_v27, %v321_v36  ;;  %v345_v49 = vmul.f32 %v344_v44, %v701_v19  ;;  %v255_v2 = vadd.f32 %v253_v22, %v236_v14  ;;  %v379_v5 = vmul.f32 %v539_v58, %v359_v51  ;;  %v549_v22 = vld [vmem:[%s1001_s3 + $0xb] ss:$0 sm:$0xff]  ;;  %v550_v27 = vld [vmem:[%s1001_s3 + $0xc] ss:$0 sm:$0xff] }
  0x52   :  { %v340_v48 = vadd.f32 %v339_v38, %v337_v42  ;;  %v310_v1 = vmax.f32 %v292_v31, %v309_v41  ;;  %v311_v39 = vadd.f32 %v309_v41, %v292_v31  ;;  %v416_v8 = vmul.f32 %v546_v52, %v355_v32  ;;  %v544_v38 = vld [vmem:[%s1001_s3 + $0x6] ss:$0 sm:$0xff] }
  0x53   :  { %v327_v53 = vadd.f32 %v326_v37, %v324_v0  ;;  %v274_v62 = vadd.f32 %v272_v55, %v255_v2  ;;  %v419_v9 = vmul.f32 %v547_v59, %v359_v51  ;;  %v380_v16 = vadd.f32 %v379_v5, %v376_v4 }
  0x54   :  { %v343_v12 = vadd.f32 %v342_v43, %v340_v48  ;;  %v552_v48 = vld [vmem:[%s1001_s3 + $0xe] ss:$0 sm:$0xff]  ;;  %v410_v59 = vstv %s409_s17  ;;  %s458_s3 = sshll.u32 %s610_s19, 4  ;;  %s459_s3 = int_to_ptr.vmem [resolvable:$true] %s458_s3 }
  0x55   :  { %v328_v57 = vmax.f32 %v327_v53, 0.0  ;;  %v275_v13 = vmul.f32 0.25, %v274_v62  ;;  %v420_v21 = vadd.f32 %v419_v9, %v416_v8  ;;  %v449_v62 = vstv %s534_s18 }
  0x56   :  { %v346_v19 = vadd.f32 %v345_v49, %v343_v12 }
  0x57   :  { %v329_v60 = vmax.f32 %v310_v1, %v328_v57  ;;  %v330_v61 = vadd.f32 %v328_v57, %v311_v39 }
  0x58   :  { %v347_v63 = vmax.f32 %v346_v19, 0.0 }
  0x5a   :  { %v348_v6 = vmax.f32 %v329_v60, %v347_v63  ;;  %v349_v7 = vadd.f32 %v347_v63, %v330_v61 }
  0x5c   :  { %v350_v14 = vmul.f32 0.25, %v349_v7  ;;  %v361_v15 = vperm.slane %v348_v6, 0 }
  0x5e   :  { %v363_v17 = vsel %vm354_vm0, %v273_v3, %v361_v15  ;;  %v365_v18 = vperm.slane %v350_v14, 0 }
  0x5f   :  { %v368_v23 = vsub.f32 %v355_v32, %v363_v17  ;;  %v383_v25 = vmul.f32 %v540_v10, %v363_v17  ;;  %v423_v26 = vmul.f32 %v548_v11, %v363_v17  ;;  %v372_v36 = vmul.f32 %v363_v17, %v355_v32 }
  0x60   :  { %v367_v29 = vsel %vm354_vm0, %v275_v13, %v365_v18 }
  0x61   :  { %v369_v30 = vand.u32 2147483647, %v368_v23  ;;  %v370_v31 = vsub.f32 %v359_v51, %v367_v29  ;;  %v384_v33 = vadd.f32 %v383_v25, %v380_v16  ;;  %v387_v37 = vmul.f32 %v541_v20, %v367_v29 }
  0x62   :  { %v424_v40 = vadd.f32 %v423_v26, %v420_v21  ;;  %v427_v41 = vmul.f32 %v549_v22, %v367_v29  ;;  %v373_v45 = vmul.f32 %v367_v29, %v359_v51  ;;  %v399_v1 = vmul.f32 %v544_v38, %v372_v36 }
  0x63   :  { %v371_v42 = vand.u32 2147483647, %v370_v31  ;;  %v391_v43 = vmul.f32 %v542_v24, %v369_v30  ;;  %v431_v44 = vmul.f32 %v550_v27, %v369_v30  ;;  %v388_v46 = vadd.f32 %v387_v37, %v384_v33 }
  0x64   :  { %v428_v0 = vadd.f32 %v427_v41, %v424_v40  ;;  %v403_v2 = vmul.f32 %v545_v47, %v373_v45  ;;  %v439_v12 = vmul.f32 %v552_v48, %v372_v36  ;;  %v443_v19 = vmul.f32 %v553_v56, %v373_v45 }
  0x65   :  { %v395_v49 = vmul.f32 %v543_v34, %v371_v42  ;;  %v435_v50 = vmul.f32 %v551_v35, %v371_v42  ;;  %v392_v28 = vadd.f32 %v391_v43, %v388_v46 }
  0x66   :  { %v432_v39 = vadd.f32 %v431_v44, %v428_v0 }
  0x67   :  { %v396_v53 = vadd.f32 %v395_v49, %v392_v28 }
  0x68   :  { %v436_v55 = vadd.f32 %v435_v50, %v432_v39 }
  0x69   :  { %v400_v57 = vadd.f32 %v399_v1, %v396_v53 }
  0x6a   :  { %v440_v58 = vadd.f32 %v439_v12, %v436_v55 }
  0x6b   :  { %v404_v54 = vadd.f32 %v403_v2, %v400_v57 }
  0x6c   :  { %v444_v51 = vadd.f32 %v443_v19, %v440_v58 }
  0x6d   :  { %v406_v32 = vsel %vm405_vm1, %v404_v54, 0.0 }
  0x6e   :  { %407 = vadd.xlane.f32.xlu0 %v406_v32  ;;  %v445_v52 = vsel %vm405_vm1, %v444_v51, 0.0 }
  0x76   :  { %446 = vadd.xlane.f32.xlu0 %v445_v52 }
  0xe1   :  { %v408_v60 = vpop.xlane.xlu0 %407 }
  0xe2   :  { %v411_v61 = vadd.f32 %v410_v59, %v408_v60 }
  0xe4   :  { %413 = vst.msk [vmem:[#allocation7] sm:$0x3] %vm412_vm2, %v411_v61 }
  0xe9   :  { %v447_v63 = vpop.xlane.xlu0 %446 }
  0xea   :  { %v450_v3 = vadd.f32 %v449_v62, %v447_v63 }
  0xec   :  { %452 = vst.msk [vmem:[#allocation7] sm:$0x3] %vm451_vm3, %v450_v3 }
  0xed   :  { %463 = dma.vmem_to_hbm [thread:$0]  %s459_s3, 32, %s461_s22, [#allocation3]  }
  0xee   :  { %606 = dma.done.wait [#allocation3], 32  }
  0xef   :  { %607 = vsyncadd [#allocation3], 4294967264 }
  0xf0   :  { %468 = vsyncpa [#allocation3], 1 }
  0xf1   :  { %469 = vsyncpa [#allocation4], 1 }
  0xf2   :  { %470 = vsyncpa [#allocation6], 1 }

</bundles_post_ra>
